<compile_context>
chip_gen: v7x
topology: tpu7x:2x2x1
jax: 0.10.0
libtpu: 0.0.40
codegen_flags: <defaults>
</compile_context>

<pallas_src>
import jax
import jax.numpy as jnp
from jax.experimental import pallas as pl
from jax.experimental.pallas import tpu as pltpu


def _round_up(n, m):
    return ((n + m - 1) // m) * m


def multi_attention_kernel(x_ref, p_ref, e_ref, w_ref, bhp_ref, bl_ref, o_ref):
    # x_ref  : (Bt, S*D)  lane-dense flattened tokens, x2[b, s*D + d] = x[b, s, d]
    # p_ref  : (Bt, S)    attention weights (pdg)
    # e_ref  : (S, S*D)   expansion matrix, E[s, s*D + d] = 1
    # w_ref  : (S*D, D)   W_comb = Wv_t @ Wl_t, stacked S times along K
    # bhp_ref: (1, D)     fused head bias projected through the output Linear
    # bl_ref : (1, D)     output Linear bias
    # o_ref  : (Bt, D)
    #
    # NOTE: inputs here are f32 so the astype calls are no-ops.  If production
    # inputs/weights are bf16, feed bf16 straight into the jnp.dot calls
    # (MXU is bf16-native with f32 accumulation); keep p in f32 on v5e.
    x = x_ref[...].astype(jnp.float32)                          # (Bt, S*D)
    p = p_ref[...].astype(jnp.float32)                          # (Bt, S)

    # Replicate p across each head-feature slot: p_rep[b, s*D+d] = p[b, s].
    # Done as a tiny K=S MXU matmul (keeps cross-lane broadcast off the XLU).
    p_rep = jnp.dot(p, e_ref[...].astype(jnp.float32),
                    preferred_element_type=jnp.float32)         # (Bt, S*D)

    # pdg-weighted tokens: lane-dense VPU multiply.
    xw = x * p_rep                                              # (Bt, S*D)

    # Single fused MXU matmul: the contraction over K = S*D implements both
    # the S-reduction and (per-head value proj  ∘  output Linear).
    out = jnp.dot(xw, w_ref[...].astype(jnp.float32),
                  preferred_element_type=jnp.float32)           # (Bt, D)

    # Bias terms: sum_s pdg[b,s] * (head_bias @ W_lin^T) + b_lin.
    psum = jnp.sum(p, axis=1, keepdims=True)                    # (Bt, 1)
    out = out + psum * bhp_ref[...].astype(jnp.float32) \
              + bl_ref[...].astype(jnp.float32)                 # (Bt, D)

    o_ref[...] = out.astype(o_ref.dtype)


def multi_attention_layer(x, pdg, head_weights, head_biases, w_lin, b_lin,
                          *, b_tile_max=512):
    """x: (B, S, D), pdg: (B, S), head_weights[h]: (dim, D), head_biases[h]: (dim,),
    w_lin: (D, D), b_lin: (D,)  ->  (B, 1, D)  with D = hidden_size = num_head*dim."""
    B, S, D = x.shape
    f32 = jnp.float32

    # ---- trace-time weight folding (weights are static, fold is free) ------
    wv_t = jnp.concatenate([w.T for w in head_weights], axis=1)        # (D, D)
    bv = jnp.concatenate(head_biases).reshape(1, D)                    # (1, D)
    wl_t = w_lin.T                                                     # (D, D)
    w_comb = wv_t.astype(f32) @ wl_t.astype(f32)                       # (D, D)
    b_head_proj = bv.astype(f32) @ wl_t.astype(f32)                    # (1, D)
    bl = b_lin.reshape(1, D).astype(f32)                               # (1, D)
    w_big = jnp.tile(w_comb, (S, 1)).astype(x.dtype)                   # (S*D, D)
    e_mat = jnp.repeat(jnp.eye(S, dtype=f32), D, axis=1).astype(x.dtype)  # (S, S*D)

    # Lane-dense layouts (free, contiguous reshapes in the wrapper).
    x2 = x.reshape(B, S * D)
    p2 = pdg.reshape(B, S)

    # ---- batch tiling -------------------------------------------------------
    if B <= 16:
        # Tiny batch: one whole-batch step (block dims == full array dims).
        b_tile, b_pad = B, B
        xp, pp = x2, p2
    else:
        # Sublane-aligned tiles; ensure >= 2 grid steps so both v7x TensorCores
        # get work; cap at b_tile_max to stay within scoped VMEM.
        b_tile = min(b_tile_max, max(8, _round_up(pl.cdiv(B, 2), 8)))
        b_pad = _round_up(B, b_tile)
        xp = jnp.pad(x2, ((0, b_pad - B), (0, 0)))
        pp = jnp.pad(p2, ((0, b_pad - B), (0, 0)))

    # ---- VMEM budget: padded, double-buffered tile footprint + headroom -----
    lane, sub = 128, 8
    itemsize = jnp.dtype(x.dtype).itemsize

    def _blk_bytes(rows, cols, isize=itemsize):
        return _round_up(rows, sub) * _round_up(cols, lane) * isize

    tile_bytes = (_blk_bytes(b_tile, S * D) + _blk_bytes(b_tile, S)
                  + _blk_bytes(b_tile, D))
    weight_bytes = (_blk_bytes(S, S * D) + _blk_bytes(S * D, D)
                    + 2 * _blk_bytes(1, D, 4))
    vmem_limit = int(min(max(2 * (tile_bytes + weight_bytes) + (4 << 20),
                             16 << 20),
                         48 << 20))

    out = pl.pallas_call(
        multi_attention_kernel,
        out_shape=jax.ShapeDtypeStruct((b_pad, D), x.dtype),
        grid_spec=pltpu.PrefetchScalarGridSpec(
            num_scalar_prefetch=0,
            grid=(b_pad // b_tile,),
            in_specs=[
                pl.BlockSpec((b_tile, S * D), lambda i: (i, 0)),  # x tile, lane-dense
                pl.BlockSpec((b_tile, S), lambda i: (i, 0)),      # pdg tile (2-D, no pad-to-lane blowup)
                pl.BlockSpec((S, S * D), lambda i: (0, 0)),       # expansion matrix (resident)
                pl.BlockSpec((S * D, D), lambda i: (0, 0)),       # fused weight (resident)
                pl.BlockSpec((1, D), lambda i: (0, 0)),           # projected head bias
                pl.BlockSpec((1, D), lambda i: (0, 0)),           # output Linear bias
            ],
            out_specs=pl.BlockSpec((b_tile, D), lambda i: (i, 0)),
        ),
        compiler_params=pltpu.CompilerParams(
            dimension_semantics=("parallel",),   # shard batch tiles across TCs (v7x)
            vmem_limit_bytes=vmem_limit,
        ),
    )(xp, pp, e_mat, w_big, b_head_proj, bl)

    return out[:B].reshape(B, 1, D)


if __name__ == "__main__":
    # Small shapes consistent with the module:
    #   hidden_size = 32, num_head = 4 -> per-head dim = 8; batch = 2, seq = 8.
    B, S, hidden_size, num_head = 2, 8, 32, 4
    dim = hidden_size // num_head

    key = jax.random.PRNGKey(0)
    keys = jax.random.split(key, 4 + 2 * num_head)
    kx, kp, kwl, kbl = keys[0], keys[1], keys[2], keys[3]
    head_keys = keys[4:]

    x = jax.random.normal(kx, (B, S, hidden_size), dtype=jnp.float32)
    pdg = jax.random.uniform(kp, (B, S), dtype=jnp.float32)

    # PyTorch-style Linear params: weight (out, in), bias (out,)
    bound = 1.0 / (hidden_size ** 0.5)
    head_ws = [
        jax.random.uniform(head_keys[2 * h], (dim, hidden_size),
                           minval=-bound, maxval=bound, dtype=jnp.float32)
        for h in range(num_head)
    ]
    head_bs = [
        jax.random.uniform(head_keys[2 * h + 1], (dim,),
                           minval=-bound, maxval=bound, dtype=jnp.float32)
        for h in range(num_head)
    ]
    w_lin = jax.random.uniform(kwl, (hidden_size, hidden_size),
                               minval=-bound, maxval=bound, dtype=jnp.float32)
    b_lin = jax.random.uniform(kbl, (hidden_size,),
                               minval=-bound, maxval=bound, dtype=jnp.float32)

    out = multi_attention_layer(x, pdg, head_ws, head_bs, w_lin, b_lin)
    out = jax.block_until_ready(out)

    # Pure-JAX reference mirroring the PyTorch forward exactly (no reassociation).
    head_outs = []
    for w, b in zip(head_ws, head_bs):
        v = jnp.einsum("bsd,hd->bsh", x, w) + b              # (B, S, dim)
        head_outs.append(jnp.matmul(pdg[:, None, :], v))     # (B, 1, dim)
    cat = jnp.concatenate(head_outs, axis=-1)                # (B, 1, hidden)
    ref = jnp.matmul(cat, w_lin.T) + b_lin                   # (B, 1, hidden)

    assert out.shape == (B, 1, hidden_size)
    assert jnp.allclose(out, ref, atol=1e-4, rtol=1e-4)

    print("KERNEL_OK")
</pallas_src>

<mosaic_0001>
module attributes {stable_mosaic.version = 11 : i64} {
  func.func @multi_attention_kernel(%arg0: i32, %arg1: memref<2x256xf32, #tpu.memory_space<vmem>>, %arg2: memref<2x8xf32, #tpu.memory_space<vmem>>, %arg3: memref<8x256xf32, #tpu.memory_space<vmem>>, %arg4: memref<256x32xf32, #tpu.memory_space<vmem>>, %arg5: memref<1x32xf32, #tpu.memory_space<vmem>>, %arg6: memref<1x32xf32, #tpu.memory_space<vmem>>, %arg7: memref<2x32xf32, #tpu.memory_space<vmem>>) attributes {dimension_semantics = [#tpu.dimension_semantics<parallel>], iteration_bounds = array<i64: 1>, scalar_prefetch = 0 : i64, scratch_operands = 0 : i64, tpu.core_type = #tpu.core_type<tc>, window_params = [{transform_indices = @transform_0, window_bounds = array<i64: 2, 256>}, {transform_indices = @transform_1, window_bounds = array<i64: 2, 8>}, {pipeline_mode = #tpu.pipeline_mode<synchronous>, transform_indices = @transform_2, window_bounds = array<i64: 8, 256>}, {pipeline_mode = #tpu.pipeline_mode<synchronous>, transform_indices = @transform_3, window_bounds = array<i64: 256, 32>}, {pipeline_mode = #tpu.pipeline_mode<synchronous>, transform_indices = @transform_4, window_bounds = array<i64: 1, 32>}, {pipeline_mode = #tpu.pipeline_mode<synchronous>, transform_indices = @transform_5, window_bounds = array<i64: 1, 32>}, {transform_indices = @transform_6, window_bounds = array<i64: 2, 32>}]} {
    %c0 = arith.constant 0 : index
    %c0_0 = arith.constant 0 : index
    %0 = vector.load %arg1[%c0, %c0_0] : memref<2x256xf32, #tpu.memory_space<vmem>>, vector<2x256xf32>
    %c0_1 = arith.constant 0 : index
    %c0_2 = arith.constant 0 : index
    %1 = vector.load %arg2[%c0_1, %c0_2] : memref<2x8xf32, #tpu.memory_space<vmem>>, vector<2x8xf32>
    %c0_3 = arith.constant 0 : index
    %c0_4 = arith.constant 0 : index
    %2 = vector.load %arg3[%c0_3, %c0_4] : memref<8x256xf32, #tpu.memory_space<vmem>>, vector<8x256xf32>
    %cst = arith.constant dense<0.000000e+00> : vector<2x256xf32>
    %3 = tpu.matmul %1, %2, %cst {dimension_numbers = #tpu.dot_dimension_numbers<[1], [0], [0], [1], [0, 0, 1, 1], [], []>} : vector<2x8xf32>, vector<8x256xf32>, vector<2x256xf32> -> vector<2x256xf32>
    %4 = arith.mulf %0, %3 : vector<2x256xf32>
    %c0_5 = arith.constant 0 : index
    %c0_6 = arith.constant 0 : index
    %5 = vector.load %arg4[%c0_5, %c0_6] : memref<256x32xf32, #tpu.memory_space<vmem>>, vector<256x32xf32>
    %cst_7 = arith.constant dense<0.000000e+00> : vector<2x32xf32>
    %6 = tpu.matmul %4, %5, %cst_7 {dimension_numbers = #tpu.dot_dimension_numbers<[1], [0], [0], [1], [0, 0, 1, 1], [], []>} : vector<2x256xf32>, vector<256x32xf32>, vector<2x32xf32> -> vector<2x32xf32>
    %cst_8 = arith.constant dense<0.000000e+00> : vector<2xf32>
    %7 = vector.multi_reduction <add>, %1, %cst_8 [1] : vector<2x8xf32> to vector<2xf32>
    %8 = vector.shape_cast %7 : vector<2xf32> to vector<2x1xf32>
    %c0_9 = arith.constant 0 : index
    %c0_10 = arith.constant 0 : index
    %9 = vector.load %arg5[%c0_9, %c0_10] : memref<1x32xf32, #tpu.memory_space<vmem>>, vector<1x32xf32>
    %10 = vector.broadcast %8 : vector<2x1xf32> to vector<2x32xf32>
    %11 = vector.broadcast %9 : vector<1x32xf32> to vector<2x32xf32>
    %12 = arith.mulf %10, %11 : vector<2x32xf32>
    %13 = arith.addf %6, %12 : vector<2x32xf32>
    %c0_11 = arith.constant 0 : index
    %c0_12 = arith.constant 0 : index
    %14 = vector.load %arg6[%c0_11, %c0_12] : memref<1x32xf32, #tpu.memory_space<vmem>>, vector<1x32xf32>
    %15 = vector.broadcast %14 : vector<1x32xf32> to vector<2x32xf32>
    %16 = arith.addf %13, %15 : vector<2x32xf32>
    %c0_13 = arith.constant 0 : index
    %c0_14 = arith.constant 0 : index
    %17 = vector.load %arg7[%c0_13, %c0_14] : memref<2x32xf32, #tpu.memory_space<vmem>>, vector<2x32xf32>
    tpu.vector_store %arg7[%c0_13, %c0_14], %16 {strides = array<i32>} : memref<2x32xf32, #tpu.memory_space<vmem>>, vector<2x32xf32>,
    return
  }
  func.func @transform_0(%arg0: i32) -> (i32, i32) {
    %c0_i32 = arith.constant 0 : i32
    %c0_i32_0 = arith.constant 0 : i32
    return %arg0, %c0_i32 : i32, i32
  }
  func.func @transform_1(%arg0: i32) -> (i32, i32) {
    %c0_i32 = arith.constant 0 : i32
    %c0_i32_0 = arith.constant 0 : i32
    return %arg0, %c0_i32 : i32, i32
  }
  func.func @transform_2(%arg0: i32) -> (i32, i32) {
    %c0_i32 = arith.constant 0 : i32
    %c0_i32_0 = arith.constant 0 : i32
    %c0_i32_1 = arith.constant 0 : i32
    return %c0_i32, %c0_i32_0 : i32, i32
  }
  func.func @transform_3(%arg0: i32) -> (i32, i32) {
    %c0_i32 = arith.constant 0 : i32
    %c0_i32_0 = arith.constant 0 : i32
    %c0_i32_1 = arith.constant 0 : i32
    return %c0_i32, %c0_i32_0 : i32, i32
  }
  func.func @transform_4(%arg0: i32) -> (i32, i32) {
    %c0_i32 = arith.constant 0 : i32
    %c0_i32_0 = arith.constant 0 : i32
    %c0_i32_1 = arith.constant 0 : i32
    return %c0_i32, %c0_i32_0 : i32, i32
  }
  func.func @transform_5(%arg0: i32) -> (i32, i32) {
    %c0_i32 = arith.constant 0 : i32
    %c0_i32_0 = arith.constant 0 : i32
    %c0_i32_1 = arith.constant 0 : i32
    return %c0_i32, %c0_i32_0 : i32, i32
  }
  func.func @transform_6(%arg0: i32) -> (i32, i32) {
    %c0_i32 = arith.constant 0 : i32
    %c0_i32_0 = arith.constant 0 : i32
    return %arg0, %c0_i32 : i32, i32
  }
}

</mosaic_0001>

<bundles_post_ra>
// kernel: tpu_custom_call.1
= control target key start
LH: loop header
LB: loop body
LE: loop exit
PB: predicated region body
PF: predicated region fallthrough
CT: control target
= control target key end

     0   :  { %vm28_vm0 = vcmask 64512   ;;  %v361_v3 = vmov 0.0   ;;  %s529_s0 = inlined_call_operand.vmem [shape: f32[2,256], index: 0, kind: input, shape index: {}]   ;;  %s530_s1 = inlined_call_operand.vmem [shape: f32[2,8], index: 1, kind: input, shape index: {}]   ;;  %s531_s2 = inlined_call_operand.vmem [shape: f32[8,256], index: 2, kind: input, shape index: {}]   ;;  %s532_s3 = inlined_call_operand.vmem [shape: f32[256,32], index: 3, kind: input, shape index: {}]   ;;  %s533_s4 = inlined_call_operand.vmem [shape: f32[1,32], index: 4, kind: input, shape index: {}]   ;;  %s534_s5 = inlined_call_operand.vmem [shape: f32[1,32], index: 5, kind: input, shape index: {}]   ;;  %s535_s6 = inlined_call_operand.hbm [shape: f32[2,32], index: 6, kind: output, shape index: {}]  }
   0x1   :  { %v27_v0 = vld [vmem:[%s531_s2 + $0x8] sm:$0xff]  ;;  %v26_v1 = vld [vmem:[%s531_s2] sm:$0xff]  ;;  %96 = vmatprep.mubr.f32.mxu0 %v361_v3  ;;  %v133_v9 = vld [vmem:[%s532_s3 + $0x90] sm:$0xff] }
   0x2   :  { %v408_v2 = vld [vmem:[%s530_s1] sm:$0x3]  ;;  %32 = vmatprep.subr.mxu0 %v27_v0  ;;  %v132_v5 = vld [vmem:[%s532_s3 + $0x88] sm:$0xff]  ;;  %v134_v10 = vld [vmem:[%s532_s3 + $0x98] sm:$0xff] }
   0x3   :  { %v131_v4 = vld [vmem:[%s532_s3 + $0x80] sm:$0xff]  ;;  %33 = vmatpush1.msra.mxu0 %v26_v1  ;;  %v116_v8 = vld [vmem:[%s532_s3 + $0x8] sm:$0xff]  ;;  %v306_v12 = vpack.c.bf16 %v134_v10, %v133_v9  ;;  %v117_v13 = vld [vmem:[%s532_s3 + $0x10] sm:$0xff] }
   0x4   :  { %v115_v6 = vld [vmem:[%s532_s3] sm:$0xff]  ;;  %v302_v7 = vpack.c.bf16 %v132_v5, %v131_v4  ;;  %264 = vmatmul.mubr.msk.f32.vlgmr.msra.gmra.mrb[0].mxu0 %vm28_vm0, %v408_v2  ;;  %v118_v14 = vld [vmem:[%s532_s3 + $0x18] sm:$0xff]  ;;  %v136_v16 = vld [vmem:[%s532_s3 + $0xa8] sm:$0xff] }
   0x5   :  { %v304_v11 = vpack.c.bf16 %v116_v8, %v115_v6  ;;  %v135_v15 = vld [vmem:[%s532_s3 + $0xa0] sm:$0xff]  ;;  %v308_v17 = vpack.c.bf16 %v118_v14, %v117_v13  ;;  %v120_v20 = vld [vmem:[%s532_s3 + $0x28] sm:$0xff]  ;;  %v137_v21 = vld [vmem:[%s532_s3 + $0xb0] sm:$0xff] }
   0x6   :  { %303 = vmatprep.subr.bf16.mxu1 %v302_v7  ;;  %v310_v18 = vpack.c.bf16 %v136_v16, %v135_v15  ;;  %v119_v19 = vld [vmem:[%s532_s3 + $0x20] sm:$0xff]  ;;  %v138_v22 = vld [vmem:[%s532_s3 + $0xb8] sm:$0xff] }
   0x7   :  { %305 = vmatpush3.bf16.msra.mxu1 %v304_v11 }
   0x8   :  { %307 = vmatprep.subr.bf16.mxu1 %v306_v12 }
   0x9   :  { %11 = vsyncpa [#allocation3], 0  ;;  %v312_v23 = vpack.c.bf16 %v120_v20, %v119_v19  ;;  %v314_v24 = vpack.c.bf16 %v138_v22, %v137_v21  ;;  %v121_v25 = vld [vmem:[%s532_s3 + $0x30] sm:$0xff]  ;;  %v122_v26 = vld [vmem:[%s532_s3 + $0x38] sm:$0xff]  ;;  %vm147_vm1 = vcmask 58368   ;;  %v109_v55 = vlaneseq }
   0xa   :  { %v139_v27 = vld [vmem:[%s532_s3 + $0xc0] sm:$0xff]  ;;  %v140_v28 = vld [vmem:[%s532_s3 + $0xc8] sm:$0xff]  ;;  %v316_v29 = vpack.c.bf16 %v122_v26, %v121_v25  ;;  %v141_v34 = vld [vmem:[%s532_s3 + $0xd0] sm:$0xff]  ;;  %v148_v52 = vsel %vm147_vm1, %v408_v2, 0.0  ;;  %v362_v53 = vmov 1983009808  }
   0xb   :  { %309 = vmatpush3.bf16.msra.mxu1 %v308_v17  ;;  %v318_v30 = vpack.c.bf16 %v140_v28, %v139_v27  ;;  %v123_v31 = vld [vmem:[%s532_s3 + $0x40] sm:$0xff]  ;;  %v124_v32 = vld [vmem:[%s532_s3 + $0x48] sm:$0xff]  ;;  %v142_v35 = vld [vmem:[%s532_s3 + $0xd8] sm:$0xff]  ;;  %149 = vadd.xlane.f32.xlu0 %v148_v52  ;;  %v107_v54 = vunpack.c.l.s4 %v362_v53  ;;  %v110_v57 = vshrl.u32 %v109_v55, 7  ;;  %vm248_vm2 = vcmask 254976  }
   0xc   :  { %311 = vmatprep.subr.bf16.mxu1 %v310_v18  ;;  %v320_v33 = vpack.c.bf16 %v124_v32, %v123_v31  ;;  %v322_v36 = vpack.c.bf16 %v142_v35, %v141_v34  ;;  %v125_v37 = vld [vmem:[%s532_s3 + $0x50] sm:$0xff]  ;;  %v126_v38 = vld [vmem:[%s532_s3 + $0x58] sm:$0xff]  ;;  %v143_v40 = vld [vmem:[%s532_s3 + $0xe0] sm:$0xff] }
   0xd   :  { %v324_v39 = vpack.c.bf16 %v126_v38, %v125_v37  ;;  %v144_v41 = vld [vmem:[%s532_s3 + $0xe8] sm:$0xff]  ;;  %v127_v43 = vld [vmem:[%s532_s3 + $0x60] sm:$0xff]  ;;  %v145_v46 = vld [vmem:[%s532_s3 + $0xf0] sm:$0xff]  ;;  %v108_v56 = vunpack.c.0.s8 %v107_v54 }
   0xe   :  { %v326_v42 = vpack.c.bf16 %v144_v41, %v143_v40  ;;  %v128_v44 = vld [vmem:[%s532_s3 + $0x68] sm:$0xff]  ;;  %v146_v47 = vld [vmem:[%s532_s3 + $0xf8] sm:$0xff]  ;;  %v129_v48 = vld [vmem:[%s532_s3 + $0x70] sm:$0xff] }
   0xf   :  { %313 = vmatpush3.bf16.msra.mxu1 %v312_v23  ;;  %v328_v45 = vpack.c.bf16 %v128_v44, %v127_v43  ;;  %v330_v49 = vpack.c.bf16 %v146_v47, %v145_v46  ;;  %v130_v50 = vld [vmem:[%s532_s3 + $0x78] sm:$0xff]  ;;  %v111_v59 = vsub.s32 %v108_v56, %v110_v57  ;;  %v24_v62 = vld [vmem:[%s529_s0] sm:$0xf]  ;;  %s363_s0 = smov [#allocation2]  }
  0x10   :  { %315 = vmatprep.subr.bf16.mxu1 %v314_v24  ;;  %v332_v51 = vpack.c.bf16 %v130_v50, %v129_v48  ;;  %v265_v4 = vld [vmem:[%s533_s4] ss:$0 sm:$0xff]  ;;  %s256_s18 = sshll.u32 %s363_s0, 4  ;;  %s257_s18 = int_to_ptr.vmem [resolvable:$true] %s256_s18 }
  0x11   :  { %v266_v9 = vld [vmem:[%s534_s5] ss:$0 sm:$0xff]  ;;  %s337_s19 = scalar_lea.vmem %s257_s18, 32  ;;  %p342_p1 = scmp.lt.s32.totalorder %s257_s18, %s257_s18 }
  0x12   :  { %p338_p0 = scmp.ne.s32.totalorder %s257_s18, %s337_s19  ;;  %p343_p2 = scmp.lt.s32.totalorder %s337_s19, %s337_s19 }
  0x13   :  { %317 = vmatpush3.bf16.msra.mxu1 %v316_v29 }
  0x14   :  { %319 = vmatprep.subr.bf16.mxu1 %v318_v30  ;;  %p344_p3 = por %p343_p2, %p342_p1 }
  0x16   :  { %p345_p4 = pnand %p344_p3, %p338_p0 }
  0x17   :  { %321 = vmatpush3.bf16.msra.mxu1 %v320_v33 }
  0x18   :  { %323 = vmatprep.subr.bf16.mxu1 %v322_v36 }
  0x1b   :  { %325 = vmatpush3.bf16.msra.mxu1 %v324_v39 }
  0x1c   :  { %327 = vmatprep.subr.bf16.mxu1 %v326_v42 }
  0x1f   :  { %329 = vmatpush3.bf16.msra.mxu1 %v328_v45 }
  0x20   :  { %331 = vmatprep.subr.bf16.mxu1 %v330_v49 }
  0x23   :  { %333 = vmatpush3.bf16.msra.mxu1 %v332_v51 }
  0x98   :  { %v150_v2 = vpop.xlane.xlu0 %149 }
  0x99   :  { %v158_v6 = vmul.f32 %v265_v4, %v150_v2 }
  0xd7   :  { %v98_v58 = vpop.f32.mrb[0].mxu0 }
  0xd8   :  { %v100_v60 = vpop.f32.mrb[1].mxu0 }
  0xd9   :  { %v105_v61 = vcombine.low %v98_v58, %v100_v60 }
  0xdb   :  { %v112_v63 = vrot.slane %v105_v61, %v111_v59 }
  0xdd   :  { %v114_v0 = vmul.f32 %v112_v63, %v24_v62 }
  0xdf   :  { %v166_v1 = vrot.slane %v114_v0, %v111_v59 }
  0xe1   :  { %v167_v3 = vcombine.high %v166_v1, %v166_v1 }
  0xe3   :  { %234 = vmatprep.mubr.f32.mxu1 %v167_v3 }
  0xe4   :  { %235 = vmatmul.mubr.f32.vlgmr.msra.gmra.mrb[0].mxu1 %v166_v1 }
 0x1b7   :  { %v299_v5 = vpop.f32.mrb[0].mxu1 }
 0x1b8   :  { %v300_v7 = vpop.f32.mrb[1].mxu1 }
 0x1b9   :  { %v301_v8 = vadd.f32 %v300_v7, %v299_v5 }
 0x1bb   :  { %v237_v10 = vadd.f32 %v301_v8, %v158_v6 }
 0x1bd   :  { %v247_v11 = vadd.f32 %v266_v9, %v237_v10 }
 0x1bf   :  { %249 = vst.msk [vmem:[#allocation2] sm:$0x3] %vm248_vm2, %v247_v11 }
 0x1c0   :  { %348 = shalt.err (!%p345_p4)
}
 0x1c1   :  { %s349_s21 = scalar_lea.hbm %s535_s6, 32 }
 0x1c2   :  { %p350_p5 = scmp.ne.s32.totalorder %s535_s6, %s349_s21  ;;  %p353_p6 = scmp.lt.u32.totalorder %s349_s21, %s535_s6 }
 0x1c4   :  { %p355_p7 = pnand %p353_p6, %p350_p5 }
 0x1c6   :  { %358 = shalt.err (!%p355_p7)
}
 0x1c7   :  { %259 = dma.vmem_to_hbm [thread:$0]  %s257_s18, 32, %s535_s6, [#allocation3]  }
 0x1c8   :  { %359 = dma.done.wait [#allocation3], 32  }
 0x1c9   :  { %360 = vsyncadd [#allocation3], 4294967264 }
 0x1ca   :  { %263 = vsyncpa [#allocation3], 1 }

</bundles_post_ra>
